<compile_context>
chip_gen: v5e
topology: v5e:2x2
jax: 0.10.0
libtpu: 0.0.40
codegen_flags: <defaults>
</compile_context>

<pallas_src>
import functools

import jax
import jax.numpy as jnp
from jax.experimental import pallas as pl
from jax.experimental.pallas import tpu as pltpu


LANE = 128


def _round_up(n, m):
    return ((n + m - 1) // m) * m


# ----------------------------------------------------------------------------
# Kernel
# ----------------------------------------------------------------------------
def actor_net_kernel(x_ref, w1_ref, b1_ref, wh_ref, bh_ref,
                     mean_ref, std_ref, *, max_action, out_pad):
    x = x_ref[...]                                            # (TM, IN)

    # hidden layer: Linear + ReLU (MXU matmul, f32 accumulate; padded hidden
    # columns are exact zeros so they contribute nothing downstream).
    h = jnp.dot(x, w1_ref[...], preferred_element_type=jnp.float32) + b1_ref[...]
    h = jnp.maximum(h, 0.0).astype(wh_ref.dtype)              # (TM, HID_PAD)

    # fused heads: one matmul producing [mean_logits | std_logits].
    ms = jnp.dot(h, wh_ref[...], preferred_element_type=jnp.float32) + bh_ref[...]
    m = ms[:, :out_pad]                                       # lane-aligned split
    s = ms[:, out_pad:]

    # mean head: max_action * tanh(.)  — full-width (TM, 128) unmasked store.
    mean_ref[...] = max_action * jnp.tanh(m)

    # std head: softplus(.)  — branch-free, overflow-safe form, matches
    # torch.nn.functional.softplus (beta=1, threshold=20) within f32 eps.
    std_ref[...] = jnp.maximum(s, 0.0) + jnp.log1p(jnp.exp(-jnp.abs(s)))


# ----------------------------------------------------------------------------
# Parameter packing (done once, outside the hot path)
# ----------------------------------------------------------------------------
def pack_params(params, dtype=jnp.float32):
    """Pad hidden/output dims to 128 lanes and fuse the two heads.

    Returns (w1p, b1p, whp, bhp) with shapes
      w1p: (in, HID_PAD)        b1p: (1, HID_PAD)        [b kept f32]
      whp: (HID_PAD, 2*OUT_PAD) bhp: (1, 2*OUT_PAD)      [mean cols | std cols]
    `dtype` may be jnp.bfloat16 to halve matmul-input bytes on v6e/v7x
    (epilogue stays f32); default f32 keeps 1e-5 parity with the reference.
    """
    w1, b1, wm, bm, ws, bs = params
    in_dim, hidden = w1.shape
    out_dim = wm.shape[1]
    hid_pad = _round_up(hidden, LANE)
    out_pad = _round_up(out_dim, LANE)

    w1p = jnp.zeros((in_dim, hid_pad), dtype).at[:, :hidden].set(w1.astype(dtype))
    b1p = jnp.zeros((1, hid_pad), jnp.float32).at[:, :hidden].set(
        b1.reshape(1, -1).astype(jnp.float32))

    whp = jnp.zeros((hid_pad, 2 * out_pad), dtype)
    whp = whp.at[:hidden, :out_dim].set(wm.astype(dtype))
    whp = whp.at[:hidden, out_pad:out_pad + out_dim].set(ws.astype(dtype))

    bhp = jnp.zeros((1, 2 * out_pad), jnp.float32)
    bhp = bhp.at[:, :out_dim].set(bm.reshape(1, -1).astype(jnp.float32))
    bhp = bhp.at[:, out_pad:out_pad + out_dim].set(bs.reshape(1, -1).astype(jnp.float32))
    return w1p, b1p, whp, bhp


# ----------------------------------------------------------------------------
# Wrapper
# ----------------------------------------------------------------------------
def actor_net_forward(x, packed, max_action, out_dim, *, block_rows=512):
    """Batch-tiled ActorNet forward. Accepts any batch size; pads rows to the
    tile size and slices the real (batch, out_dim) results off afterwards."""
    w1p, b1p, whp, bhp = packed
    batch, in_dim = x.shape
    hid_pad = w1p.shape[1]
    out_pad = whp.shape[1] // 2

    x = x.astype(w1p.dtype)

    # Tile over batch: TM rows per grid step (>=8, <=block_rows), rows padded.
    tm = min(block_rows, _round_up(max(batch, 8), 8))
    padded_batch = _round_up(batch, tm)
    if padded_batch != batch:
        x = jnp.pad(x, ((0, padded_batch - batch), (0, 0)))
    grid = (padded_batch // tm,)

    kernel = functools.partial(actor_net_kernel,
                               max_action=float(max_action), out_pad=out_pad)

    def resident(shape):
        # Weights/biases: same block every grid step -> stay resident in VMEM.
        return pl.BlockSpec(shape, lambda i: (0, 0))

    mean_p, std_p = pl.pallas_call(
        kernel,
        out_shape=(
            jax.ShapeDtypeStruct((padded_batch, out_pad), jnp.float32),
            jax.ShapeDtypeStruct((padded_batch, out_pad), jnp.float32),
        ),
        grid_spec=pltpu.PrefetchScalarGridSpec(
            num_scalar_prefetch=0,
            grid=grid,
            in_specs=[
                pl.BlockSpec((tm, in_dim), lambda i: (i, 0)),   # streamed x
                resident((in_dim, hid_pad)),                    # W1 (padded)
                resident((1, hid_pad)),                         # b1 (padded)
                resident((hid_pad, 2 * out_pad)),               # fused head W
                resident((1, 2 * out_pad)),                     # fused head b
            ],
            out_specs=(
                pl.BlockSpec((tm, out_pad), lambda i: (i, 0)),  # mean slab
                pl.BlockSpec((tm, out_pad), lambda i: (i, 0)),  # std slab
            ),
        ),
        compiler_params=pltpu.CompilerParams(
            dimension_semantics=("parallel",)),                 # 2x on v7x
    )(x, w1p, b1p, whp, bhp)

    return mean_p[:batch, :out_dim], std_p[:batch, :out_dim]


# ----------------------------------------------------------------------------
# Init + pure-JAX reference
# ----------------------------------------------------------------------------
def init_params(key, in_dim, hidden, out_dim):
    """Synthetic init mirroring the module: weights ~ N(0, 0.1), biases small
    uniform (PyTorch Linear default bias scale)."""
    k1, k2, k3, k4, k5, k6 = jax.random.split(key, 6)
    w1 = 0.1 * jax.random.normal(k1, (in_dim, hidden), jnp.float32)
    b1 = (1.0 / jnp.sqrt(in_dim)) * jax.random.uniform(
        k2, (hidden,), jnp.float32, minval=-1.0, maxval=1.0)
    wm = 0.1 * jax.random.normal(k3, (hidden, out_dim), jnp.float32)
    bm = (1.0 / jnp.sqrt(hidden)) * jax.random.uniform(
        k4, (out_dim,), jnp.float32, minval=-1.0, maxval=1.0)
    ws = 0.1 * jax.random.normal(k5, (hidden, out_dim), jnp.float32)
    bs = (1.0 / jnp.sqrt(hidden)) * jax.random.uniform(
        k6, (out_dim,), jnp.float32, minval=-1.0, maxval=1.0)
    return w1, b1, wm, bm, ws, bs


def actor_net_ref(x, params, max_action):
    w1, b1, wm, bm, ws, bs = params
    h = jax.nn.relu(x @ w1 + b1)
    mean = max_action * jnp.tanh(h @ wm + bm)
    std = jax.nn.softplus(h @ ws + bs)
    return mean, std


# ----------------------------------------------------------------------------
# Self-test
# ----------------------------------------------------------------------------
if __name__ == "__main__":
    in_dim, hidden, out_dim = 8, 100, 4
    max_action = 2.0

    key = jax.random.PRNGKey(0)
    kx, kp, kx2 = jax.random.split(key, 3)
    params = init_params(kp, in_dim, hidden, out_dim)
    packed = pack_params(params)   # f32; pass dtype=jnp.bfloat16 for v6e/v7x speed

    # Small-shape check (batch=2, single 8-row tile).
    x = jax.random.normal(kx, (2, in_dim), jnp.float32)
    mean, std = actor_net_forward(x, packed, max_action, out_dim)
    jax.block_until_ready((mean, std))
    mean_r, std_r = actor_net_ref(x, params, max_action)
    assert mean.shape == (2, out_dim) and std.shape == (2, out_dim)
    assert jnp.allclose(mean, mean_r, atol=1e-5, rtol=1e-5)
    assert jnp.allclose(std, std_r, atol=1e-5, rtol=1e-5)

    # Larger-batch check exercising the batch grid + row padding (1030 -> 3 tiles).
    x2 = jax.random.normal(kx2, (1030, in_dim), jnp.float32)
    mean2, std2 = actor_net_forward(x2, packed, max_action, out_dim)
    jax.block_until_ready((mean2, std2))
    mean2_r, std2_r = actor_net_ref(x2, params, max_action)
    assert jnp.allclose(mean2, mean2_r, atol=1e-5, rtol=1e-5)
    assert jnp.allclose(std2, std2_r, atol=1e-5, rtol=1e-5)

    print("KERNEL_OK")
</pallas_src>

<mosaic_0001>
module attributes {stable_mosaic.version = 11 : i64} {
  func.func @actor_net_kernel(%arg0: i32, %arg1: memref<8x8xf32, #tpu.memory_space<vmem>>, %arg2: memref<8x128xf32, #tpu.memory_space<vmem>>, %arg3: memref<1x128xf32, #tpu.memory_space<vmem>>, %arg4: memref<128x256xf32, #tpu.memory_space<vmem>>, %arg5: memref<1x256xf32, #tpu.memory_space<vmem>>, %arg6: memref<8x128xf32, #tpu.memory_space<vmem>>, %arg7: memref<8x128xf32, #tpu.memory_space<vmem>>) attributes {dimension_semantics = [#tpu.dimension_semantics<parallel>], iteration_bounds = array<i64: 1>, scalar_prefetch = 0 : i64, scratch_operands = 0 : i64, tpu.core_type = #tpu.core_type<tc>, window_params = [{transform_indices = @transform_0, window_bounds = array<i64: 8, 8>}, {pipeline_mode = #tpu.pipeline_mode<synchronous>, transform_indices = @transform_1, window_bounds = array<i64: 8, 128>}, {pipeline_mode = #tpu.pipeline_mode<synchronous>, transform_indices = @transform_2, window_bounds = array<i64: 1, 128>}, {pipeline_mode = #tpu.pipeline_mode<synchronous>, transform_indices = @transform_3, window_bounds = array<i64: 128, 256>}, {pipeline_mode = #tpu.pipeline_mode<synchronous>, transform_indices = @transform_4, window_bounds = array<i64: 1, 256>}, {transform_indices = @transform_5, window_bounds = array<i64: 8, 128>}, {transform_indices = @transform_6, window_bounds = array<i64: 8, 128>}]} {
    %c0 = arith.constant 0 : index
    %c0_0 = arith.constant 0 : index
    %0 = vector.load %arg1[%c0, %c0_0] : memref<8x8xf32, #tpu.memory_space<vmem>>, vector<8x8xf32>
    %c0_1 = arith.constant 0 : index
    %c0_2 = arith.constant 0 : index
    %1 = vector.load %arg2[%c0_1, %c0_2] : memref<8x128xf32, #tpu.memory_space<vmem>>, vector<8x128xf32>
    %cst = arith.constant dense<0.000000e+00> : vector<8x128xf32>
    %2 = tpu.matmul %0, %1, %cst {dimension_numbers = #tpu.dot_dimension_numbers<[1], [0], [0], [1], [0, 0, 1, 1], [], []>} : vector<8x8xf32>, vector<8x128xf32>, vector<8x128xf32> -> vector<8x128xf32>
    %c0_3 = arith.constant 0 : index
    %c0_4 = arith.constant 0 : index
    %3 = vector.load %arg3[%c0_3, %c0_4] : memref<1x128xf32, #tpu.memory_space<vmem>>, vector<1x128xf32>
    %4 = vector.broadcast %3 : vector<1x128xf32> to vector<8x128xf32>
    %5 = arith.addf %2, %4 : vector<8x128xf32>
    %cst_5 = arith.constant 0.000000e+00 : f32
    %6 = vector.broadcast %cst_5 : f32 to vector<8x128xf32>
    %7 = arith.maximumf %5, %6 : vector<8x128xf32>
    %c0_6 = arith.constant 0 : index
    %c0_7 = arith.constant 0 : index
    %8 = vector.load %arg4[%c0_6, %c0_7] : memref<128x256xf32, #tpu.memory_space<vmem>>, vector<128x256xf32>
    %cst_8 = arith.constant dense<0.000000e+00> : vector<8x256xf32>
    %9 = tpu.matmul %7, %8, %cst_8 {dimension_numbers = #tpu.dot_dimension_numbers<[1], [0], [0], [1], [0, 0, 1, 1], [], []>} : vector<8x128xf32>, vector<128x256xf32>, vector<8x256xf32> -> vector<8x256xf32>
    %c0_9 = arith.constant 0 : index
    %c0_10 = arith.constant 0 : index
    %10 = vector.load %arg5[%c0_9, %c0_10] : memref<1x256xf32, #tpu.memory_space<vmem>>, vector<1x256xf32>
    %11 = vector.broadcast %10 : vector<1x256xf32> to vector<8x256xf32>
    %12 = arith.addf %9, %11 : vector<8x256xf32>
    %13 = vector.extract_strided_slice %12 {offsets = [0, 0], sizes = [8, 128], strides = [1, 1]} : vector<8x256xf32> to vector<8x128xf32>
    %14 = vector.extract_strided_slice %12 {offsets = [0, 128], sizes = [8, 128], strides = [1, 1]} : vector<8x256xf32> to vector<8x128xf32>
    %15 = math.tanh %13 : vector<8x128xf32>
    %cst_11 = arith.constant 2.000000e+00 : f32
    %16 = vector.broadcast %cst_11 : f32 to vector<8x128xf32>
    %17 = arith.mulf %16, %15 : vector<8x128xf32>
    %c0_12 = arith.constant 0 : index
    %c0_13 = arith.constant 0 : index
    %18 = vector.load %arg6[%c0_12, %c0_13] : memref<8x128xf32, #tpu.memory_space<vmem>>, vector<8x128xf32>
    tpu.vector_store %arg6[%c0_12, %c0_13], %17 {strides = array<i32>} : memref<8x128xf32, #tpu.memory_space<vmem>>, vector<8x128xf32>,
    %cst_14 = arith.constant 0.000000e+00 : f32
    %19 = vector.broadcast %cst_14 : f32 to vector<8x128xf32>
    %20 = arith.maximumf %14, %19 : vector<8x128xf32>
    %21 = math.absf %14 : vector<8x128xf32>
    %cst_15 = arith.constant 0.000000e+00 : f32
    %22 = vector.broadcast %cst_15 : f32 to vector<8x128xf32>
    %23 = arith.subf %22, %21 : vector<8x128xf32>
    %24 = math.exp %23 : vector<8x128xf32>
    %25 = math.log1p %24 : vector<8x128xf32>
    %26 = arith.addf %20, %25 : vector<8x128xf32>
    %c0_16 = arith.constant 0 : index
    %c0_17 = arith.constant 0 : index
    %27 = vector.load %arg7[%c0_16, %c0_17] : memref<8x128xf32, #tpu.memory_space<vmem>>, vector<8x128xf32>
    tpu.vector_store %arg7[%c0_16, %c0_17], %26 {strides = array<i32>} : memref<8x128xf32, #tpu.memory_space<vmem>>, vector<8x128xf32>,
    return
  }
  func.func @transform_0(%arg0: i32) -> (i32, i32) {
    %c0_i32 = arith.constant 0 : i32
    %c0_i32_0 = arith.constant 0 : i32
    return %arg0, %c0_i32 : i32, i32
  }
  func.func @transform_1(%arg0: i32) -> (i32, i32) {
    %c0_i32 = arith.constant 0 : i32
    %c0_i32_0 = arith.constant 0 : i32
    %c0_i32_1 = arith.constant 0 : i32
    return %c0_i32, %c0_i32_0 : i32, i32
  }
  func.func @transform_2(%arg0: i32) -> (i32, i32) {
    %c0_i32 = arith.constant 0 : i32
    %c0_i32_0 = arith.constant 0 : i32
    %c0_i32_1 = arith.constant 0 : i32
    return %c0_i32, %c0_i32_0 : i32, i32
  }
  func.func @transform_3(%arg0: i32) -> (i32, i32) {
    %c0_i32 = arith.constant 0 : i32
    %c0_i32_0 = arith.constant 0 : i32
    %c0_i32_1 = arith.constant 0 : i32
    return %c0_i32, %c0_i32_0 : i32, i32
  }
  func.func @transform_4(%arg0: i32) -> (i32, i32) {
    %c0_i32 = arith.constant 0 : i32
    %c0_i32_0 = arith.constant 0 : i32
    %c0_i32_1 = arith.constant 0 : i32
    return %c0_i32, %c0_i32_0 : i32, i32
  }
  func.func @transform_5(%arg0: i32) -> (i32, i32) {
    %c0_i32 = arith.constant 0 : i32
    %c0_i32_0 = arith.constant 0 : i32
    return %arg0, %c0_i32 : i32, i32
  }
  func.func @transform_6(%arg0: i32) -> (i32, i32) {
    %c0_i32 = arith.constant 0 : i32
    %c0_i32_0 = arith.constant 0 : i32
    return %arg0, %c0_i32 : i32, i32
  }
}

</mosaic_0001>

<bundles_post_ra>
// kernel: tpu_custom_call.1
= control target key start
LH: loop header
LB: loop body
LE: loop exit
PB: predicated region body
PF: predicated region fallthrough
CT: control target
= control target key end

     0   :  { %12 = vsyncpa [#allocation3], 0  ;;  %s435_s0 = inlined_call_operand.hbm [shape: f32[8,8], index: 0, kind: input, shape index: {}]   ;;  %s436_s1 = inlined_call_operand.hbm [shape: f32[8,128], index: 1, kind: input, shape index: {}]   ;;  %s437_s2 = inlined_call_operand.vmem [shape: f32[1,128], index: 2, kind: input, shape index: {}]   ;;  %s438_s3 = inlined_call_operand.hbm [shape: f32[128,256], index: 3, kind: input, shape index: {}]   ;;  %s439_s4 = inlined_call_operand.vmem [shape: f32[1,256], index: 4, kind: input, shape index: {}]   ;;  %s440_s5 = inlined_call_operand.hbm [shape: f32[8,128], index: 5, kind: output, shape index: {0}]   ;;  %s441_s6 = inlined_call_operand.hbm [shape: f32[8,128], index: 6, kind: output, shape index: {1}]  }
   0x1   :  { %13 = vsyncpa [#allocation6], 0 }
   0x2   :  { %14 = vsyncpa [#allocation4], 0  ;;  %s32_s23 = sshll.u32 %s436_s1, 4  ;;  %s33_s23 = int_to_ptr.hbm [resolvable:$true] %s32_s23 }
   0x3   :  { %15 = vsyncpa [#allocation10], 0  ;;  %s372_s24 = smov [#allocation5]   ;;  %s21_s28 = sshll.u32 %s435_s0, 4  ;;  %s22_s28 = int_to_ptr.hbm [resolvable:$true] %s21_s28 }
   0x4   :  { %s34_s25 = sshll.u32 %s372_s24, 4  ;;  %s373_s29 = smov [#allocation2]   ;;  %s35_s25 = int_to_ptr.vmem [resolvable:$true] %s34_s25 }
   0x5   :  { %37 = dma.hbm_to_vmem [thread:$0]  %s33_s23, 128, %s35_s25, [#allocation6]  }
   0x6   :  { %s23_s30 = sshll.u32 %s373_s29, 4  ;;  %s44_s9 = sshll.u32 %s438_s3, 4  ;;  %s24_s30 = int_to_ptr.vmem [resolvable:$true] %s23_s30  ;;  %s45_s9 = int_to_ptr.hbm [resolvable:$true] %s44_s9 }
   0x7   :  { %26 = dma.hbm_to_vmem [thread:$0]  %s22_s28, 128, %s24_s30, [#allocation3]  }
   0x8   :  { %s374_s1 = smov [#allocation7]   ;;  %s375_s11 = smov 256  }
   0x9   :  { %s46_s10 = sshll.u32 %s374_s1, 4  ;;  %s376_s12 = smov 16   ;;  %s47_s10 = int_to_ptr.vmem [resolvable:$true] %s46_s10 }
   0xa   :  { %52 = dma.hbm_to_vmem [thread:$0]  %s45_s9, 4096, %s47_s10, [#allocation6], %s375_s11, %s375_s11, %s376_s12  }
   0xb   :  { %364 = dma.done.wait [#allocation3], 128  }
   0xc   :  { %365 = vsyncadd [#allocation3], 4294967168 }
   0xd   :  { %366 = dma.done.wait [#allocation6], 4224  }
   0xe   :  { %367 = vsyncadd [#allocation6], 4294963072  ;;  %vm73_vm0 = vcmask 64512   ;;  %v68_v0 = vld [vmem:[#allocation5] sm:$0xff]  ;;  %v67_v1 = vld [vmem:[#allocation2] sm:$0xff]  ;;  %s377_s15 = smov [#allocation8]  }
   0xf   :  { %v128_v2 = vld [vmem:[#allocation7 + $0xf0] sm:$0xff]  ;;  %92 = vmatpush.msra.mxu0 %v68_v0  ;;  %v129_v3 = vld [vmem:[#allocation7 + $0xf8] sm:$0xff]  ;;  %v126_v4 = vld [vmem:[#allocation7 + $0xe0] sm:$0xff]  ;;  %s200_s16 = sshll.u32 %s377_s15, 4  ;;  %s202_s18 = sshll.u32 %s440_s5, 4  ;;  %s201_s16 = int_to_ptr.vmem [resolvable:$true] %s200_s16  ;;  %s203_s18 = int_to_ptr.hbm [resolvable:$true] %s202_s18 }
  0x10   :  { %136 = vmatpush.msra.mxu1 %v128_v2  ;;  %v127_v5 = vld [vmem:[#allocation7 + $0xe8] sm:$0xff]  ;;  %229 = vmatmul.msk.f32.vlgmr.msra.gmra.mxu0 %vm73_vm0, %v67_v1  ;;  %v124_v6 = vld [vmem:[#allocation7 + $0xd0] sm:$0xff]  ;;  %v125_v7 = vld [vmem:[#allocation7 + $0xd8] sm:$0xff]  ;;  %s213_s21 = sshll.u32 %s441_s6, 4  ;;  %s214_s21 = int_to_ptr.hbm [resolvable:$true] %s213_s21 }
  0x11   :  { %156 = vmatpush.msra.mxu2 %v129_v3  ;;  %v122_v8 = vld [vmem:[#allocation7 + $0xc0] sm:$0xff]  ;;  %v123_v9 = vld [vmem:[#allocation7 + $0xc8] sm:$0xff]  ;;  %v120_v10 = vld [vmem:[#allocation7 + $0xb0] sm:$0xff] }
  0x12   :  { %137 = vmatpush.msra.mxu1 %v126_v4  ;;  %v121_v11 = vld [vmem:[#allocation7 + $0xb8] sm:$0xff]  ;;  %v118_v12 = vld [vmem:[#allocation7 + $0xa0] sm:$0xff]  ;;  %v119_v13 = vld [vmem:[#allocation7 + $0xa8] sm:$0xff] }
  0x13   :  { %157 = vmatpush.msra.mxu2 %v127_v5  ;;  %v116_v14 = vld [vmem:[#allocation7 + $0x90] sm:$0xff]  ;;  %v117_v15 = vld [vmem:[#allocation7 + $0x98] sm:$0xff]  ;;  %v114_v16 = vld [vmem:[#allocation7 + $0x80] sm:$0xff] }
  0x14   :  { %138 = vmatpush.msra.mxu1 %v124_v6  ;;  %v115_v17 = vld [vmem:[#allocation7 + $0x88] sm:$0xff]  ;;  %v112_v18 = vld [vmem:[#allocation7 + $0x70] sm:$0xff]  ;;  %v113_v19 = vld [vmem:[#allocation7 + $0x78] sm:$0xff] }
  0x15   :  { %158 = vmatpush.msra.mxu2 %v125_v7  ;;  %v110_v20 = vld [vmem:[#allocation7 + $0x60] sm:$0xff]  ;;  %v111_v21 = vld [vmem:[#allocation7 + $0x68] sm:$0xff]  ;;  %v108_v22 = vld [vmem:[#allocation7 + $0x50] sm:$0xff] }
  0x16   :  { %139 = vmatpush.msra.mxu1 %v122_v8  ;;  %v109_v23 = vld [vmem:[#allocation7 + $0x58] sm:$0xff]  ;;  %v106_v24 = vld [vmem:[#allocation7 + $0x40] sm:$0xff]  ;;  %v107_v25 = vld [vmem:[#allocation7 + $0x48] sm:$0xff] }
  0x17   :  { %159 = vmatpush.msra.mxu2 %v123_v9  ;;  %v104_v26 = vld [vmem:[#allocation7 + $0x30] sm:$0xff]  ;;  %v105_v27 = vld [vmem:[#allocation7 + $0x38] sm:$0xff]  ;;  %v102_v28 = vld [vmem:[#allocation7 + $0x20] sm:$0xff] }
  0x18   :  { %140 = vmatpush.msra.mxu1 %v120_v10  ;;  %v103_v29 = vld [vmem:[#allocation7 + $0x28] sm:$0xff]  ;;  %v100_v30 = vld [vmem:[#allocation7 + $0x10] sm:$0xff]  ;;  %v101_v31 = vld [vmem:[#allocation7 + $0x18] sm:$0xff] }
  0x19   :  { %160 = vmatpush.msra.mxu2 %v121_v11  ;;  %v98_v32 = vld [vmem:[#allocation7] sm:$0xff]  ;;  %v99_v33 = vld [vmem:[#allocation7 + $0x8] sm:$0xff]  ;;  %v237_v34 = vld [vmem:[%s437_s2] ss:$0 sm:$0xff] }
  0x1a   :  { %141 = vmatpush.msra.mxu1 %v118_v12  ;;  %v130_v38 = vld [vmem:[%s439_s4] sm:$0x3]  ;;  %s378_s4 = smov [#allocation9]  }
  0x1b   :  { %161 = vmatpush.msra.mxu2 %v119_v13  ;;  %v132_v39 = vperm.slane %v130_v38, 0  ;;  %v133_v42 = vperm.slane %v130_v38, 1  ;;  %s211_s5 = sshll.u32 %s378_s4, 4  ;;  %s212_s5 = int_to_ptr.vmem [resolvable:$true] %s211_s5 }
  0x1c   :  { %142 = vmatpush.msra.mxu1 %v116_v14 }
  0x1d   :  { %162 = vmatpush.msra.mxu2 %v117_v15 }
  0x1e   :  { %143 = vmatpush.msra.mxu1 %v114_v16 }
  0x1f   :  { %163 = vmatpush.msra.mxu2 %v115_v17 }
  0x20   :  { %144 = vmatpush.msra.mxu1 %v112_v18 }
  0x21   :  { %164 = vmatpush.msra.mxu2 %v113_v19 }
  0x22   :  { %145 = vmatpush.msra.mxu1 %v110_v20 }
  0x23   :  { %165 = vmatpush.msra.mxu2 %v111_v21 }
  0x24   :  { %146 = vmatpush.msra.mxu1 %v108_v22 }
  0x25   :  { %166 = vmatpush.msra.mxu2 %v109_v23 }
  0x26   :  { %147 = vmatpush.msra.mxu1 %v106_v24 }
  0x27   :  { %167 = vmatpush.msra.mxu2 %v107_v25 }
  0x28   :  { %148 = vmatpush.msra.mxu1 %v104_v26 }
  0x29   :  { %168 = vmatpush.msra.mxu2 %v105_v27 }
  0x2a   :  { %149 = vmatpush.msra.mxu1 %v102_v28 }
  0x2b   :  { %169 = vmatpush.msra.mxu2 %v103_v29 }
  0x2c   :  { %150 = vmatpush.msra.mxu1 %v100_v30 }
  0x2d   :  { %170 = vmatpush.msra.mxu2 %v101_v31 }
  0x2e   :  { %151 = vmatpush.msra.mxu1 %v98_v32 }
  0x2f   :  { %171 = vmatpush.msra.mxu2 %v99_v33 }
  0x8d   :  { %v94_v35 = vpop.f32.mrf.mxu0 }
  0x8e   :  { %v95_v36 = vadd.f32 %v237_v34, %v94_v35 }
  0x90   :  { %v97_v37 = vmax.f32 %v95_v36, 0.0 }
  0x92   :  { %152 = vmatmul.f32.vlgmr.msra.gmra.mxu1 %v97_v37  ;;  %172 = vmatmul.f32.vlgmr.msra.gmra.mxu2 %v97_v37 }
 0x10f   :  { %v153_v40 = vpop.f32.mrf.mxu1 }
 0x110   :  { %v154_v41 = vadd.f32 %v153_v40, %v132_v39 }
 0x112   :  { %238 = vtanh.f32 %v154_v41 }
 0x115   :  { %v173_v43 = vpop.f32.mrf.mxu2 }
 0x116   :  { %v174_v44 = vadd.f32 %v173_v43, %v133_v42 }
 0x118   :  { %v239_v45 = vpop.eup %238  ;;  %v180_v46 = vand.u32 2147483647, %v174_v44  ;;  %v179_v58 = vmax.f32 %v174_v44, 0.0 }
 0x119   :  { %v177_v47 = vmul.f32 2.0, %v239_v45 }
 0x11a   :  { %v181_v48 = vsub.f32 0.0, %v180_v46 }
 0x11b   :  { %178 = vst [vmem:[#allocation8] sm:$0xff] %v177_v47 }
 0x11c   :  { %v182_v49 = vmul.f32 1.442695, %v181_v48  ;;  %205 = dma.vmem_to_hbm [thread:$0]  %s201_s16, 128, %s203_s18, [#allocation4]  }
 0x11e   :  { %240 = vpow2.f32 %v182_v49 }
 0x124   :  { %v241_v50 = vpop.eup %240 }
 0x125   :  { %v184_v51 = vadd.f32 1.0, %v241_v50  ;;  %v187_v52 = vmul.f32 -0.5, %v241_v50  ;;  %v190_v54 = vand.u32 2147483647, %v241_v50 }
 0x127   :  { %242 = vlog2.f32 %v184_v51  ;;  %v188_v53 = vadd.f32 1.0, %v187_v52  ;;  %vm191_vm1 = vcmp.lt.f32.partialorder %v190_v54, 0.0004427343 }
 0x129   :  { %v189_v57 = vmul.f32 %v241_v50, %v188_v53 }
 0x12d   :  { %v243_v55 = vpop.eup %242 }
 0x12e   :  { %v186_v56 = vmul.f32 0.6931472, %v243_v55 }
 0x130   :  { %v192_v59 = vsel %vm191_vm1, %v189_v57, %v186_v56 }
 0x131   :  { %v193_v60 = vadd.f32 %v192_v59, %v179_v58 }
 0x133   :  { %194 = vst [vmem:[#allocation9] sm:$0xff] %v193_v60 }
 0x134   :  { %216 = dma.vmem_to_hbm [thread:$0]  %s212_s5, 128, %s214_s21, [#allocation10]  }
 0x135   :  { %368 = dma.done.wait [#allocation4], 128  }
 0x136   :  { %369 = vsyncadd [#allocation4], 4294967168 }
 0x137   :  { %370 = dma.done.wait [#allocation10], 128  }
 0x138   :  { %371 = vsyncadd [#allocation10], 4294967168 }
 0x139   :  { %225 = vsyncpa [#allocation3], 1 }
 0x13a   :  { %226 = vsyncpa [#allocation6], 1 }
 0x13b   :  { %227 = vsyncpa [#allocation4], 1 }
 0x13c   :  { %228 = vsyncpa [#allocation10], 1 }

</bundles_post_ra>
